<compile_context>
chip_gen: v5e
topology: v5e:2x2
jax: 0.10.0
libtpu: 0.0.40
codegen_flags: <defaults>
</compile_context>

<pallas_src>
import jax
import jax.numpy as jnp
from jax.experimental import pallas as pl
from jax.experimental.pallas import tpu as pltpu

# --- model config (small, consistent with the module's constructor) ----------
N_LAYERS = 2            # number of hidden (Linear + activation) blocks
INPUT_SIZE = 64
HIDDEN_SIZE = 32
HIDDEN_PAD = 128        # hidden dim zero-padded to a full lane width
OUTPUT_SIZE = 16
BATCH_LEADING = (2, 4)  # x is (2, 4, 64) -> reshape(-1, 64) -> (8, 64)

MAX_TILE_M = 8192       # rows/grid step; ~5-6 MiB of VMEM at these dims
MIN_GRID_STEPS = 2      # aim for >=2 steps (v7x megacore + pipelining)


def _round_up(n, m):
    return ((n + m - 1) // m) * m


def mlp_kernel(x_ref, w_in_ref, b_in_ref, w_h_ref, b_h_ref,
               w_out_ref, b_out_ref, o_ref):
    # input linear: cast x to bf16 in-kernel (MXU operands), f32 accumulation.
    h = jnp.dot(x_ref[...].astype(jnp.bfloat16), w_in_ref[...],
                preferred_element_type=jnp.float32) + b_in_ref[...]

    # hidden blocks: Linear + ReLU (N_LAYERS is static -> unrolled at trace time)
    for l in range(N_LAYERS):
        h = jnp.dot(h.astype(jnp.bfloat16), w_h_ref[l],
                    preferred_element_type=jnp.float32) + b_h_ref[l]
        h = jnp.maximum(h, 0.0)  # activation_fn = nn.ReLU(), kept in f32 (v5e-safe)

    # output linear (padded hidden rows of w_out are zero -> exact result)
    logits = jnp.dot(h.astype(jnp.bfloat16), w_out_ref[...],
                     preferred_element_type=jnp.float32) + b_out_ref[...]

    # softmax over dim=1 (feature axis), numerically stable, EXACT normalization.
    m = jnp.max(logits, axis=1, keepdims=True)
    e = jnp.exp(logits - m)
    o_ref[...] = (e / jnp.sum(e, axis=1, keepdims=True)).astype(o_ref.dtype)


def prepare_params(params):
    """One-time param prep: zero-pad hidden dim to 128, cast weights to bf16.

    Padded columns/rows are exactly zero, so results are bit-identical to the
    unpadded model; the extra MXU FLOPs are free at this occupancy.
    """
    w_in, b_in, w_h, b_h, w_out, b_out = params
    hp = HIDDEN_PAD - HIDDEN_SIZE
    w_in_p = jnp.pad(w_in, ((0, 0), (0, hp))).astype(jnp.bfloat16)
    b_in_p = jnp.pad(b_in, ((0, 0), (0, hp)))                       # f32
    w_h_p = jnp.pad(w_h, ((0, 0), (0, hp), (0, hp))).astype(jnp.bfloat16)
    b_h_p = jnp.pad(b_h, ((0, 0), (0, 0), (0, hp)))                 # f32
    w_out_p = jnp.pad(w_out, ((0, hp), (0, 0))).astype(jnp.bfloat16)
    return w_in_p, b_in_p, w_h_p, b_h_p, w_out_p, b_out


def mlp_forward(x, prepared_params):
    w_in, b_in, w_h, b_h, w_out, b_out = prepared_params

    # glue: the reshape(-1, input_dim) from the PyTorch forward (stays f32).
    x2d = x.reshape(-1, INPUT_SIZE)
    batch = x2d.shape[0]

    # batch tile: multiple of 8 sublanes, large cap, >= MIN_GRID_STEPS steps
    # when the batch allows; cdiv grid handles a ragged last tile (no padding).
    tile_m = _round_up(pl.cdiv(batch, MIN_GRID_STEPS), 8)
    tile_m = max(8, min(MAX_TILE_M, tile_m))
    grid = (pl.cdiv(batch, tile_m),)

    # activations/outputs tiled over batch; weights resident (constant index_map).
    in_specs = [
        pl.BlockSpec((tile_m, INPUT_SIZE), lambda i: (i, 0)),                      # x (f32)
        pl.BlockSpec((INPUT_SIZE, HIDDEN_PAD), lambda i: (0, 0)),                  # w_in (bf16)
        pl.BlockSpec((1, HIDDEN_PAD), lambda i: (0, 0)),                           # b_in (f32)
        pl.BlockSpec((N_LAYERS, HIDDEN_PAD, HIDDEN_PAD), lambda i: (0, 0, 0)),     # w_h (bf16)
        pl.BlockSpec((N_LAYERS, 1, HIDDEN_PAD), lambda i: (0, 0, 0)),              # b_h (f32)
        pl.BlockSpec((HIDDEN_PAD, OUTPUT_SIZE), lambda i: (0, 0)),                 # w_out (bf16)
        pl.BlockSpec((1, OUTPUT_SIZE), lambda i: (0, 0)),                          # b_out (f32)
    ]
    out_spec = pl.BlockSpec((tile_m, OUTPUT_SIZE), lambda i: (i, 0))

    return pl.pallas_call(
        mlp_kernel,
        out_shape=jax.ShapeDtypeStruct((batch, OUTPUT_SIZE), jnp.float32),
        grid=grid,
        in_specs=in_specs,
        out_specs=out_spec,
        compiler_params=pltpu.CompilerParams(
            dimension_semantics=("parallel",)),
    )(x2d, w_in, b_in, w_h, b_h, w_out, b_out)


def init_params(key):
    ks = jax.random.split(key, 6)
    scale = 0.1
    w_in = scale * jax.random.normal(ks[0], (INPUT_SIZE, HIDDEN_SIZE), jnp.float32)
    b_in = scale * jax.random.normal(ks[1], (1, HIDDEN_SIZE), jnp.float32)
    w_h = scale * jax.random.normal(ks[2], (N_LAYERS, HIDDEN_SIZE, HIDDEN_SIZE), jnp.float32)
    b_h = scale * jax.random.normal(ks[3], (N_LAYERS, 1, HIDDEN_SIZE), jnp.float32)
    w_out = scale * jax.random.normal(ks[4], (HIDDEN_SIZE, OUTPUT_SIZE), jnp.float32)
    b_out = scale * jax.random.normal(ks[5], (1, OUTPUT_SIZE), jnp.float32)
    return w_in, b_in, w_h, b_h, w_out, b_out


def mlp_reference(x, params):
    """Pure-JAX reference, numerics-matched to the kernel (bf16 matmul inputs,
    f32 accumulation / elementwise, exact softmax).  Semantics match the
    PyTorch module (eval mode)."""
    w_in, b_in, w_h, b_h, w_out, b_out = params
    xb = x.reshape(-1, INPUT_SIZE).astype(jnp.bfloat16)
    h = jnp.dot(xb, w_in.astype(jnp.bfloat16),
                preferred_element_type=jnp.float32) + b_in
    for l in range(N_LAYERS):
        h = jnp.dot(h.astype(jnp.bfloat16), w_h[l].astype(jnp.bfloat16),
                    preferred_element_type=jnp.float32) + b_h[l]
        h = jnp.maximum(h, 0.0)
    logits = jnp.dot(h.astype(jnp.bfloat16), w_out.astype(jnp.bfloat16),
                     preferred_element_type=jnp.float32) + b_out
    return jax.nn.softmax(logits, axis=1)


if __name__ == "__main__":
    key = jax.random.PRNGKey(0)
    k_x, k_p = jax.random.split(key)
    x = jax.random.normal(k_x, (*BATCH_LEADING, INPUT_SIZE), jnp.float32)
    params = init_params(k_p)
    prepared = prepare_params(params)

    out = mlp_forward(x, prepared)
    out = jax.block_until_ready(out)

    ref = mlp_reference(x, params)
    assert out.shape == (2 * 4, OUTPUT_SIZE)
    assert jnp.allclose(out, ref, atol=2e-3, rtol=2e-3), "mismatch vs reference"
    assert jnp.allclose(jnp.sum(out, axis=1), 1.0, atol=1e-3), "softmax rows must sum to 1"

    print("KERNEL_OK")
</pallas_src>

<mosaic_0001>
module attributes {stable_mosaic.version = 11 : i64} {
  func.func @mlp_kernel(%arg0: i32, %arg1: memref<8x64xf32, #tpu.memory_space<vmem>>, %arg2: memref<64x128xbf16, #tpu.memory_space<vmem>>, %arg3: memref<1x128xf32, #tpu.memory_space<vmem>>, %arg4: memref<2x128x128xbf16, #tpu.memory_space<vmem>>, %arg5: memref<2x1x128xf32, #tpu.memory_space<vmem>>, %arg6: memref<128x16xbf16, #tpu.memory_space<vmem>>, %arg7: memref<1x16xf32, #tpu.memory_space<vmem>>, %arg8: memref<8x16xf32, #tpu.memory_space<vmem>>) attributes {dimension_semantics = [#tpu.dimension_semantics<parallel>], iteration_bounds = array<i64: 1>, scalar_prefetch = 0 : i64, scratch_operands = 0 : i64, tpu.core_type = #tpu.core_type<tc>, window_params = [{transform_indices = @transform_0, window_bounds = array<i64: 8, 64>}, {pipeline_mode = #tpu.pipeline_mode<synchronous>, transform_indices = @transform_1, window_bounds = array<i64: 64, 128>}, {pipeline_mode = #tpu.pipeline_mode<synchronous>, transform_indices = @transform_2, window_bounds = array<i64: 1, 128>}, {pipeline_mode = #tpu.pipeline_mode<synchronous>, transform_indices = @transform_3, window_bounds = array<i64: 2, 128, 128>}, {pipeline_mode = #tpu.pipeline_mode<synchronous>, transform_indices = @transform_4, window_bounds = array<i64: 2, 1, 128>}, {pipeline_mode = #tpu.pipeline_mode<synchronous>, transform_indices = @transform_5, window_bounds = array<i64: 128, 16>}, {pipeline_mode = #tpu.pipeline_mode<synchronous>, transform_indices = @transform_6, window_bounds = array<i64: 1, 16>}, {transform_indices = @transform_7, window_bounds = array<i64: 8, 16>}]} {
    %c0 = arith.constant 0 : index
    %c0_0 = arith.constant 0 : index
    %0 = vector.load %arg1[%c0, %c0_0] : memref<8x64xf32, #tpu.memory_space<vmem>>, vector<8x64xf32>
    %1 = arith.truncf %0 : vector<8x64xf32> to vector<8x64xbf16>
    %c0_1 = arith.constant 0 : index
    %c0_2 = arith.constant 0 : index
    %2 = vector.load %arg2[%c0_1, %c0_2] : memref<64x128xbf16, #tpu.memory_space<vmem>>, vector<64x128xbf16>
    %cst = arith.constant dense<0.000000e+00> : vector<8x128xf32>
    %3 = tpu.matmul %1, %2, %cst {dimension_numbers = #tpu.dot_dimension_numbers<[1], [0], [0], [1], [0, 0, 1, 1], [], []>} : vector<8x64xbf16>, vector<64x128xbf16>, vector<8x128xf32> -> vector<8x128xf32>
    %c0_3 = arith.constant 0 : index
    %c0_4 = arith.constant 0 : index
    %4 = vector.load %arg3[%c0_3, %c0_4] : memref<1x128xf32, #tpu.memory_space<vmem>>, vector<1x128xf32>
    %5 = vector.broadcast %4 : vector<1x128xf32> to vector<8x128xf32>
    %6 = arith.addf %3, %5 : vector<8x128xf32>
    %7 = arith.truncf %6 : vector<8x128xf32> to vector<8x128xbf16>
    %c0_5 = arith.constant 0 : index
    %c0_6 = arith.constant 0 : index
    %c0_7 = arith.constant 0 : index
    %8 = vector.load %arg4[%c0_5, %c0_6, %c0_7] : memref<2x128x128xbf16, #tpu.memory_space<vmem>>, vector<1x128x128xbf16>
    %9 = vector.shape_cast %8 : vector<1x128x128xbf16> to vector<128x128xbf16>
    %cst_8 = arith.constant dense<0.000000e+00> : vector<8x128xf32>
    %10 = tpu.matmul %7, %9, %cst_8 {dimension_numbers = #tpu.dot_dimension_numbers<[1], [0], [0], [1], [0, 0, 1, 1], [], []>} : vector<8x128xbf16>, vector<128x128xbf16>, vector<8x128xf32> -> vector<8x128xf32>
    %c0_9 = arith.constant 0 : index
    %c0_10 = arith.constant 0 : index
    %c0_11 = arith.constant 0 : index
    %11 = vector.load %arg5[%c0_9, %c0_10, %c0_11] : memref<2x1x128xf32, #tpu.memory_space<vmem>>, vector<1x1x128xf32>
    %12 = vector.shape_cast %11 : vector<1x1x128xf32> to vector<1x128xf32>
    %13 = vector.broadcast %12 : vector<1x128xf32> to vector<8x128xf32>
    %14 = arith.addf %10, %13 : vector<8x128xf32>
    %cst_12 = arith.constant 0.000000e+00 : f32
    %15 = vector.broadcast %cst_12 : f32 to vector<8x128xf32>
    %16 = arith.maximumf %14, %15 : vector<8x128xf32>
    %17 = arith.truncf %16 : vector<8x128xf32> to vector<8x128xbf16>
    %c1 = arith.constant 1 : index
    %c0_13 = arith.constant 0 : index
    %c0_14 = arith.constant 0 : index
    %18 = vector.load %arg4[%c1, %c0_13, %c0_14] : memref<2x128x128xbf16, #tpu.memory_space<vmem>>, vector<1x128x128xbf16>
    %19 = vector.shape_cast %18 : vector<1x128x128xbf16> to vector<128x128xbf16>
    %cst_15 = arith.constant dense<0.000000e+00> : vector<8x128xf32>
    %20 = tpu.matmul %17, %19, %cst_15 {dimension_numbers = #tpu.dot_dimension_numbers<[1], [0], [0], [1], [0, 0, 1, 1], [], []>} : vector<8x128xbf16>, vector<128x128xbf16>, vector<8x128xf32> -> vector<8x128xf32>
    %c1_16 = arith.constant 1 : index
    %c0_17 = arith.constant 0 : index
    %c0_18 = arith.constant 0 : index
    %21 = vector.load %arg5[%c1_16, %c0_17, %c0_18] : memref<2x1x128xf32, #tpu.memory_space<vmem>>, vector<1x1x128xf32>
    %22 = vector.shape_cast %21 : vector<1x1x128xf32> to vector<1x128xf32>
    %23 = vector.broadcast %22 : vector<1x128xf32> to vector<8x128xf32>
    %24 = arith.addf %20, %23 : vector<8x128xf32>
    %cst_19 = arith.constant 0.000000e+00 : f32
    %25 = vector.broadcast %cst_19 : f32 to vector<8x128xf32>
    %26 = arith.maximumf %24, %25 : vector<8x128xf32>
    %27 = arith.truncf %26 : vector<8x128xf32> to vector<8x128xbf16>
    %c0_20 = arith.constant 0 : index
    %c0_21 = arith.constant 0 : index
    %28 = vector.load %arg6[%c0_20, %c0_21] : memref<128x16xbf16, #tpu.memory_space<vmem>>, vector<128x16xbf16>
    %cst_22 = arith.constant dense<0.000000e+00> : vector<8x16xf32>
    %29 = tpu.matmul %27, %28, %cst_22 {dimension_numbers = #tpu.dot_dimension_numbers<[1], [0], [0], [1], [0, 0, 1, 1], [], []>} : vector<8x128xbf16>, vector<128x16xbf16>, vector<8x16xf32> -> vector<8x16xf32>
    %c0_23 = arith.constant 0 : index
    %c0_24 = arith.constant 0 : index
    %30 = vector.load %arg7[%c0_23, %c0_24] : memref<1x16xf32, #tpu.memory_space<vmem>>, vector<1x16xf32>
    %31 = vector.broadcast %30 : vector<1x16xf32> to vector<8x16xf32>
    %32 = arith.addf %29, %31 : vector<8x16xf32>
    %cst_25 = arith.constant dense<0xFF800000> : vector<8xf32>
    %33 = vector.multi_reduction <maximumf>, %32, %cst_25 [1] : vector<8x16xf32> to vector<8xf32>
    %34 = vector.shape_cast %33 : vector<8xf32> to vector<8x1xf32>
    %35 = vector.broadcast %34 : vector<8x1xf32> to vector<8x16xf32>
    %36 = arith.subf %32, %35 : vector<8x16xf32>
    %37 = math.exp %36 : vector<8x16xf32>
    %cst_26 = arith.constant dense<0.000000e+00> : vector<8xf32>
    %38 = vector.multi_reduction <add>, %37, %cst_26 [1] : vector<8x16xf32> to vector<8xf32>
    %39 = vector.shape_cast %38 : vector<8xf32> to vector<8x1xf32>
    %40 = vector.broadcast %39 : vector<8x1xf32> to vector<8x16xf32>
    %41 = arith.divf %37, %40 : vector<8x16xf32>
    %c0_27 = arith.constant 0 : index
    %c0_28 = arith.constant 0 : index
    %42 = vector.load %arg8[%c0_27, %c0_28] : memref<8x16xf32, #tpu.memory_space<vmem>>, vector<8x16xf32>
    tpu.vector_store %arg8[%c0_27, %c0_28], %41 {strides = array<i32>} : memref<8x16xf32, #tpu.memory_space<vmem>>, vector<8x16xf32>,
    return
  }
  func.func @transform_0(%arg0: i32) -> (i32, i32) {
    %c0_i32 = arith.constant 0 : i32
    %c0_i32_0 = arith.constant 0 : i32
    return %arg0, %c0_i32 : i32, i32
  }
  func.func @transform_1(%arg0: i32) -> (i32, i32) {
    %c0_i32 = arith.constant 0 : i32
    %c0_i32_0 = arith.constant 0 : i32
    %c0_i32_1 = arith.constant 0 : i32
    return %c0_i32, %c0_i32_0 : i32, i32
  }
  func.func @transform_2(%arg0: i32) -> (i32, i32) {
    %c0_i32 = arith.constant 0 : i32
    %c0_i32_0 = arith.constant 0 : i32
    %c0_i32_1 = arith.constant 0 : i32
    return %c0_i32, %c0_i32_0 : i32, i32
  }
  func.func @transform_3(%arg0: i32) -> (i32, i32, i32) {
    %c0_i32 = arith.constant 0 : i32
    %c0_i32_0 = arith.constant 0 : i32
    %c0_i32_1 = arith.constant 0 : i32
    %c0_i32_2 = arith.constant 0 : i32
    return %c0_i32, %c0_i32_0, %c0_i32_1 : i32, i32, i32
  }
  func.func @transform_4(%arg0: i32) -> (i32, i32, i32) {
    %c0_i32 = arith.constant 0 : i32
    %c0_i32_0 = arith.constant 0 : i32
    %c0_i32_1 = arith.constant 0 : i32
    %c0_i32_2 = arith.constant 0 : i32
    return %c0_i32, %c0_i32_0, %c0_i32_1 : i32, i32, i32
  }
  func.func @transform_5(%arg0: i32) -> (i32, i32) {
    %c0_i32 = arith.constant 0 : i32
    %c0_i32_0 = arith.constant 0 : i32
    %c0_i32_1 = arith.constant 0 : i32
    return %c0_i32, %c0_i32_0 : i32, i32
  }
  func.func @transform_6(%arg0: i32) -> (i32, i32) {
    %c0_i32 = arith.constant 0 : i32
    %c0_i32_0 = arith.constant 0 : i32
    %c0_i32_1 = arith.constant 0 : i32
    return %c0_i32, %c0_i32_0 : i32, i32
  }
  func.func @transform_7(%arg0: i32) -> (i32, i32) {
    %c0_i32 = arith.constant 0 : i32
    %c0_i32_0 = arith.constant 0 : i32
    return %arg0, %c0_i32 : i32, i32
  }
}

</mosaic_0001>

<bundles_post_ra>
// kernel: tpu_custom_call.1
= control target key start
LH: loop header
LB: loop body
LE: loop exit
PB: predicated region body
PF: predicated region fallthrough
CT: control target
= control target key end

     0   :  { %12 = vsyncpa [#allocation3], 0  ;;  %s702_s0 = inlined_call_operand.vmem [shape: f32[8,64], index: 0, kind: input, shape index: {}]   ;;  %s703_s1 = inlined_call_operand.vmem [shape: bf16[64,128], index: 1, kind: input, shape index: {}]   ;;  %s704_s2 = inlined_call_operand.vmem [shape: f32[1,128], index: 2, kind: input, shape index: {}]   ;;  %s705_s3 = inlined_call_operand.hbm [shape: bf16[2,128,128], index: 3, kind: input, shape index: {}]   ;;  %s706_s4 = inlined_call_operand.vmem [shape: f32[2,1,128], index: 4, kind: input, shape index: {}]   ;;  %s707_s5 = inlined_call_operand.vmem [shape: bf16[128,16], index: 5, kind: input, shape index: {}]   ;;  %s708_s6 = inlined_call_operand.vmem [shape: f32[1,16], index: 6, kind: input, shape index: {}]   ;;  %s709_s7 = inlined_call_operand.hbm [shape: f32[8,16], index: 7, kind: output, shape index: {}]  }
   0x1   :  { %13 = vsyncpa [#allocation4], 0  ;;  %s24_s26 = sshll.u32 %s705_s3, 4  ;;  %s598_s27 = smov [#allocation2]   ;;  %s25_s26 = int_to_ptr.hbm [resolvable:$true] %s24_s26 }
   0x2   :  { %s26_s28 = sshll.u32 %s598_s27, 4  ;;  %s599_s29 = smov 64   ;;  %s27_s28 = int_to_ptr.vmem [resolvable:$true] %s26_s28 }
   0x3   :  { %s600_s30 = smov 4  }
   0x4   :  { %32 = dma.hbm_to_vmem [thread:$0]  %s25_s26, 2048, %s27_s28, [#allocation3], %s599_s29, %s599_s29, %s600_s30  }
   0x5   :  { %594 = dma.done.wait [#allocation3], 2048  }
   0x6   :  { %595 = vsyncadd [#allocation3], 4294965248  ;;  %v509_v0 = vld [vmem:[%s703_s1 + $0x18] sm:$0xff]  ;;  %v508_v2 = vld [vmem:[%s703_s1 + $0x10] sm:$0xff]  ;;  %vm82_vm0 = vcmask 523264   ;;  %vm349_vm1 = vcmask 130048  }
   0x7   :  { %v517_v1 = vld [vmem:[#allocation2 + $0x38] sm:$0xff]  ;;  %90 = vmatpush.bf16.msra.mxu0 %v509_v0  ;;  %v516_v3 = vld [vmem:[#allocation2 + $0x30] sm:$0xff]  ;;  %v507_v4 = vld [vmem:[%s703_s1 + $0x8] sm:$0xff]  ;;  %s382_s15 = sshll.u32 %s709_s7, 4  ;;  %s383_s15 = int_to_ptr.hbm [resolvable:$true] %s382_s15 }
   0x8   :  { %168 = vmatpush.bf16.msra.mxu1 %v517_v1  ;;  %v515_v5 = vld [vmem:[#allocation2 + $0x28] sm:$0xff]  ;;  %v506_v6 = vld [vmem:[%s703_s1] sm:$0xff]  ;;  %v513_v10 = vld [vmem:[#allocation2 + $0x18] sm:$0xff] }
   0x9   :  { %v44_v7 = vld [vmem:[%s702_s0] sm:$0xff]  ;;  %v512_v11 = vld [vmem:[#allocation2 + $0x10] sm:$0xff]  ;;  %v511_v12 = vld [vmem:[#allocation2 + $0x8] sm:$0xff] }
   0xa   :  { %v514_v8 = vld [vmem:[#allocation2 + $0x20] sm:$0xff]  ;;  %v45_v9 = vpack.c.bf16 %v44_v7, %v44_v7  ;;  %v525_v14 = vld [vmem:[#allocation2 + $0x78] sm:$0xff]  ;;  %v524_v15 = vld [vmem:[#allocation2 + $0x70] sm:$0xff] }
   0xb   :  { %91 = vmatpush.bf16.msra.mxu0 %v508_v2  ;;  %v510_v13 = vld [vmem:[#allocation2] sm:$0xff]  ;;  %253 = vmatpush.bf16.msra.mxu2 %v525_v14  ;;  %v523_v16 = vld [vmem:[#allocation2 + $0x68] sm:$0xff]  ;;  %v521_v18 = vld [vmem:[#allocation2 + $0x58] sm:$0xff] }
   0xc   :  { %169 = vmatpush.bf16.msra.mxu1 %v516_v3  ;;  %v522_v17 = vld [vmem:[#allocation2 + $0x60] sm:$0xff]  ;;  %v520_v19 = vld [vmem:[#allocation2 + $0x50] sm:$0xff]  ;;  %v519_v25 = vld [vmem:[#allocation2 + $0x48] sm:$0xff] }
   0xd   :  { %v538_v20 = vld [vmem:[%s704_s2] ss:$0 sm:$0xff]  ;;  %v533_v27 = vld [vmem:[%s707_s5 + $0x38] sm:$0xff]  ;;  %v532_v28 = vld [vmem:[%s707_s5 + $0x30] sm:$0xff] }
   0xe   :  { %v518_v26 = vld [vmem:[#allocation2 + $0x40] sm:$0xff]  ;;  %336 = vmatpush.bf16.msra.mxu3 %v533_v27  ;;  %v531_v29 = vld [vmem:[%s707_s5 + $0x28] sm:$0xff]  ;;  %v529_v31 = vld [vmem:[%s707_s5 + $0x18] sm:$0xff] }
   0xf   :  { %92 = vmatpush.bf16.msra.mxu0 %v507_v4  ;;  %254 = vmatpush.bf16.msra.mxu2 %v524_v15  ;;  %v530_v30 = vld [vmem:[%s707_s5 + $0x20] sm:$0xff]  ;;  %v528_v32 = vld [vmem:[%s707_s5 + $0x10] sm:$0xff]  ;;  %v527_v39 = vld [vmem:[%s707_s5 + $0x8] sm:$0xff] }
  0x10   :  { %170 = vmatpush.bf16.msra.mxu1 %v515_v5  ;;  %v539_v33 = vld [vmem:[%s706_s4] ss:$0 sm:$0xff]  ;;  %v540_v41 = vld [vmem:[%s706_s4 + $0x1] ss:$0 sm:$0xff]  ;;  %s601_s4 = smov [#allocation5]  }
  0x11   :  { %v526_v40 = vld [vmem:[%s707_s5] sm:$0xff]  ;;  %s380_s5 = sshll.u32 %s601_s4, 4  ;;  %s381_s5 = int_to_ptr.vmem [resolvable:$true] %s380_s5 }
  0x12   :  { %337 = vmatpush.bf16.msra.mxu3 %v532_v28  ;;  %v541_v47 = vld [vmem:[%s708_s6] ss:$0 sm:$0xff] }
  0x13   :  { %93 = vmatpush.bf16.msra.mxu0 %v506_v6  ;;  %255 = vmatpush.bf16.msra.mxu2 %v523_v16 }
  0x14   :  { %171 = vmatpush.bf16.msra.mxu1 %v514_v8 }
  0x16   :  { %408 = vmatmul.msk.bf16.vlgmr.msra.gmra.mxu0 %vm82_vm0, %v45_v9  ;;  %338 = vmatpush.bf16.msra.mxu3 %v531_v29 }
  0x17   :  { %256 = vmatpush.bf16.msra.mxu2 %v522_v17 }
  0x18   :  { %172 = vmatpush.bf16.msra.mxu1 %v513_v10 }
  0x1a   :  { %339 = vmatpush.bf16.msra.mxu3 %v530_v30 }
  0x1b   :  { %257 = vmatpush.bf16.msra.mxu2 %v521_v18 }
  0x1c   :  { %173 = vmatpush.bf16.msra.mxu1 %v512_v11 }
  0x1e   :  { %340 = vmatpush.bf16.msra.mxu3 %v529_v31 }
  0x1f   :  { %258 = vmatpush.bf16.msra.mxu2 %v520_v19 }
  0x20   :  { %174 = vmatpush.bf16.msra.mxu1 %v511_v12 }
  0x22   :  { %341 = vmatpush.bf16.msra.mxu3 %v528_v32 }
  0x23   :  { %259 = vmatpush.bf16.msra.mxu2 %v519_v25 }
  0x24   :  { %175 = vmatpush.bf16.msra.mxu1 %v510_v13 }
  0x26   :  { %342 = vmatpush.bf16.msra.mxu3 %v527_v39 }
  0x27   :  { %260 = vmatpush.bf16.msra.mxu2 %v518_v26 }
  0x2a   :  { %343 = vmatpush.bf16.msra.mxu3 %v526_v40 }
  0x93   :  { %v95_v21 = vpop.f32.mrf.mxu0 }
  0x94   :  { %v96_v22 = vadd.f32 %v538_v20, %v95_v21 }
  0x96   :  { %v99_v23 = vpack.c.bf16 %v96_v22, %v96_v22 }
  0x98   :  { %176 = vmatmul.bf16.vlgmr.msra.gmra.mxu1 %v99_v23 }
  0x9b   :  { %v97_v24 = vpop.f32.mrf.mxu0 }
 0x115   :  { %v177_v34 = vpop.f32.mrf.mxu1 }
 0x116   :  { %v178_v35 = vadd.f32 %v539_v33, %v177_v34 }
 0x118   :  { %v181_v36 = vmax.f32 %v178_v35, 0.0 }
 0x11a   :  { %v182_v37 = vpack.c.bf16 %v181_v36, %v181_v36 }
 0x11c   :  { %261 = vmatmul.bf16.vlgmr.msra.gmra.mxu2 %v182_v37 }
 0x11d   :  { %v179_v38 = vpop.f32.mrf.mxu1 }
 0x19f   :  { %v262_v42 = vpop.f32.mrf.mxu2 }
 0x1a0   :  { %v263_v43 = vadd.f32 %v540_v41, %v262_v42 }
 0x1a2   :  { %v266_v44 = vmax.f32 %v263_v43, 0.0 }
 0x1a4   :  { %v267_v45 = vpack.c.bf16 %v266_v44, %v266_v44 }
 0x1a6   :  { %344 = vmatmul.bf16.vlgmr.msra.gmra.mxu3 %v267_v45 }
 0x1a7   :  { %v264_v46 = vpop.f32.mrf.mxu2 }
 0x229   :  { %v345_v48 = vpop.f32.mrf.mxu3 }
 0x22a   :  { %v346_v49 = vadd.f32 %v541_v47, %v345_v48 }
 0x22c   :  { %v350_v50 = vsel %vm349_vm1, %v346_v49, -inf }
 0x22d   :  { %351 = vmax.xlane.f32.xlu0 %v350_v50 }
 0x231   :  { %v347_v51 = vpop.f32.mrf.mxu3 }
 0x2a0   :  { %v352_v52 = vpop.xlane.xlu0 %351 }
 0x2a1   :  { %v353_v53 = vsub.f32 %v346_v49, %v352_v52 }
 0x2a3   :  { %v354_v54 = vmul.f32 1.442695, %v353_v53 }
 0x2a5   :  { %542 = vpow2.f32 %v354_v54 }
 0x2ab   :  { %v543_v55 = vpop.eup %542 }
 0x2ac   :  { %v356_v56 = vsel %vm349_vm1, %v543_v55, 0.0 }
 0x2ad   :  { %357 = vadd.xlane.f32.xlu0 %v356_v56 }
 0x320   :  { %v358_v57 = vpop.xlane.xlu0 %357 }
 0x321   :  { %544 = vrcp.f32 %v358_v57  ;;  %v370_v61 = vand.u32 2147483648, %v358_v57  ;;  %v368_v63 = vand.u32 2147483647, %v358_v57  ;;  %vm364_vm3 = vweird.f32 %v358_v57 }
 0x323   :  { %v371_v1 = vor.u32 1.1754944e-38, %v370_v61  ;;  %vm369_vm5 = vcmp.eq.f32.partialorder %v368_v63, 8.507059e+37 }
 0x327   :  { %v545_v58 = vpop.eup %544 }
 0x328   :  { %v360_v59 = vmul.f32 %v545_v58, %v358_v57  ;;  %vm365_vm2 = vweird.f32 %v545_v58 }
 0x329   :  { %vm366_vm4 = vmor %vm364_vm3, %vm365_vm2 }
 0x32a   :  { %v361_v60 = vsub.f32 1.0, %v360_v59 }
 0x32c   :  { %v362_v62 = vmul.f32 %v545_v58, %v361_v60 }
 0x32e   :  { %v363_v0 = vadd.f32 %v545_v58, %v362_v62 }
 0x330   :  { %v367_v2 = vsel %vm366_vm4, %v545_v58, %v363_v0 }
 0x331   :  { %v372_v3 = vsel %vm369_vm5, %v371_v1, %v367_v2 }
 0x332   :  { %v373_v4 = vmul.f32 %v543_v55, %v372_v3 }
 0x334   :  { %374 = vst.msk [vmem:[#allocation5] sm:$0xff] %vm349_vm1, %v373_v4 }
 0x335   :  { %385 = dma.vmem_to_hbm [thread:$0]  %s381_s5, 128, %s383_s15, [#allocation4]  }
 0x336   :  { %596 = dma.done.wait [#allocation4], 128  }
 0x337   :  { %597 = vsyncadd [#allocation4], 4294967168 }
 0x338   :  { %390 = vsyncpa [#allocation3], 1 }
 0x339   :  { %391 = vsyncpa [#allocation4], 1 }

</bundles_post_ra>
